<compile_context>
chip_gen: v6e
topology: v6e:2x2x1
jax: 0.10.0
libtpu: 0.0.40
codegen_flags: <defaults>
</compile_context>

<pallas_src>
import functools
import math
import numpy as np
import jax
import jax.numpy as jnp
from jax import lax
from jax.experimental import pallas as pl
from jax.experimental.pallas import tpu as pltpu

NUM_KPS = 17           # cfg.DATATYPE == 'person'
PRIOR_PROB = 0.01      # cfg.MODEL.FCOS.PRIOR_PROB
SCORE_THRESH = 0.05    # hardcoded in get_local_max_coords
LOGIT_THRESH = math.log(SCORE_THRESH / (1.0 - SCORE_THRESH))  # sigmoid^-1(0.05)


# ------------------------- fused head (one kernel) ---------------------------
def _fused_head_kernel(x_ref, w_ref, b_ref, colmask_ref, rowmask_ref,
                       heat_ref, mask_ref, pw_ref, *, HW, W, tile_hw):
    """Per grid step (n, t):
         x_ref:       (C, tile_hw) bf16   — feature tile (rows t*tile_rows..)
         w_ref:       (K, C)      bf16    — 1x1 conv weight
         b_ref:       (K, 1)      f32     — conv bias
         colmask_ref: (2, tile_hw) f32    — additive -inf masks: [0]=right nbr,
                                            [1]=left nbr (column edges)
         rowmask_ref: (2, HW)      f32    — additive -inf masks: [0]=below nbr,
                                            [1]=above nbr (row edges)
         heat_ref:    (K, HW) f32  out    — resident across t (full image)
         mask_ref:    (K, HW) int8 out    — resident across t, written at last t
         pw_ref:      (K, HW) f32 scratch — W-direction pooled heat
    """
    t = pl.program_id(1)
    start = pl.multiple_of(t * tile_hw, tile_hw)

    # 1x1 conv over channels == matmul on the MXU (bf16 x bf16 -> f32 acc);
    # output is already NCHW-flat: lanes = spatial (dense), sublanes = K.
    heat = jnp.dot(w_ref[...], x_ref[...],
                   preferred_element_type=jnp.float32) + b_ref[...]
    heat_ref[:, pl.ds(start, tile_hw)] = heat

    # W-direction pass of the separable 3x3 max pool (tile-local: tiles are
    # whole rows, so horizontal neighbors never cross a tile boundary).
    cm = colmask_ref[...]
    nbr_r = pltpu.roll(heat, shift=tile_hw - 1, axis=1) + cm[0:1]   # heat[i+1]
    nbr_l = pltpu.roll(heat, shift=1, axis=1) + cm[1:2]             # heat[i-1]
    pw = jnp.maximum(heat, jnp.maximum(nbr_r, nbr_l))
    pw_ref[:, pl.ds(start, tile_hw)] = pw

    # H-direction pass + threshold mask once the whole image is resident.
    @pl.when(t == pl.num_programs(1) - 1)
    def _():
        heat_full = heat_ref[...]                                   # (K, HW)
        pw_full = pw_ref[...]
        rm = rowmask_ref[...]
        below = pltpu.roll(pw_full, shift=HW - W, axis=1) + rm[0:1]  # pw[i+W]
        above = pltpu.roll(pw_full, shift=W, axis=1) + rm[1:2]       # pw[i-W]
        pooled = jnp.maximum(pw_full, jnp.maximum(below, above))
        keep = (pooled == heat_full) & (heat_full > jnp.float32(LOGIT_THRESH))
        mask_ref[...] = keep.astype(jnp.int8)


def _pick_tile_rows(H, W, C, itemsize=2, budget_bytes=2 << 20):
    """Largest row-count r dividing H with lane-aligned tile (r*W % 128 == 0)
    whose bf16 feature tile fits the per-buffer budget."""
    best = None
    smallest = None
    for r in range(1, H + 1):
        if H % r:
            continue
        thw = r * W
        if thw % 128 != 0 and thw != H * W:
            continue                      # would violate the (8,128) constraint
        if smallest is None:
            smallest = r
        if C * thw * itemsize <= budget_bytes:
            best = r
    if best is None:
        # TODO(synk): at sizes where no lane-aligned row tiling exists under
        # budget, pad W to a multiple of 128 instead of whole-image blocks.
        best = smallest if smallest is not None else H
    return best


def heatmaps_head(feature_nchw, weight_kc, bias, *, tile_rows=None):
    """Fused 1x1-conv + bias + 3x3-local-max + threshold-mask head (NCHW)."""
    N, C, H, W = feature_nchw.shape
    K = weight_kc.shape[0]
    HW = H * W
    if tile_rows is None:
        tile_rows = _pick_tile_rows(H, W, C)
    assert H % tile_rows == 0
    tile_hw = tile_rows * W
    assert tile_hw % 128 == 0 or tile_hw == HW
    T = HW // tile_hw

    # bf16 feature/weight stream: halves the dominant HBM read, native MXU path.
    x = feature_nchw.reshape(N, C, HW).astype(jnp.bfloat16)
    w_bf = weight_kc.astype(jnp.bfloat16)
    b2 = bias.reshape(K, 1).astype(jnp.float32)

    # Precomputed additive edge masks (0 where the neighbor is valid, -inf at
    # the image border) — no per-element div/mod inside the kernel.
    lane = jnp.arange(HW, dtype=jnp.int32)
    w_pos = lane % W
    neg_inf = jnp.float32(-jnp.inf)
    colmask = jnp.stack([
        jnp.where(w_pos[:tile_hw] < W - 1, 0.0, neg_inf),   # right neighbor
        jnp.where(w_pos[:tile_hw] >= 1, 0.0, neg_inf),      # left  neighbor
    ]).astype(jnp.float32)                                   # (2, tile_hw)
    rowmask = jnp.stack([
        jnp.where(lane < HW - W, 0.0, neg_inf),              # row below
        jnp.where(lane >= W, 0.0, neg_inf),                  # row above
    ]).astype(jnp.float32)                                   # (2, HW)

    kernel = functools.partial(_fused_head_kernel, HW=HW, W=W, tile_hw=tile_hw)
    heat_flat, mask_flat = pl.pallas_call(
        kernel,
        out_shape=(jax.ShapeDtypeStruct((N, K, HW), jnp.float32),
                   jax.ShapeDtypeStruct((N, K, HW), jnp.int8)),
        grid_spec=pltpu.PrefetchScalarGridSpec(
            num_scalar_prefetch=0,
            grid=(N, T),
            in_specs=[
                pl.BlockSpec((None, C, tile_hw), lambda n, t: (n, 0, t)),
                pl.BlockSpec((K, C), lambda n, t: (0, 0)),
                pl.BlockSpec((K, 1), lambda n, t: (0, 0)),
                pl.BlockSpec((2, tile_hw), lambda n, t: (0, 0)),
                pl.BlockSpec((2, HW), lambda n, t: (0, 0)),
            ],
            out_specs=(
                pl.BlockSpec((None, K, HW), lambda n, t: (n, 0, 0)),
                pl.BlockSpec((None, K, HW), lambda n, t: (n, 0, 0)),
            ),
            scratch_shapes=[pltpu.VMEM((K, HW), jnp.float32)]),
        compiler_params=pltpu.CompilerParams(
            dimension_semantics=("parallel", "arbitrary"),
            vmem_limit_bytes=32 * 1024 * 1024),
    )(x, w_bf, b2, colmask, rowmask)
    return (heat_flat.reshape(N, K, H, W),            # NCHW, like PyTorch
            mask_flat.reshape(N, K, H, W))


# ------------------------------ param init ----------------------------------
def init_params(key, in_channels, num_kps=NUM_KPS):
    # __init__: Conv2d weights ~ N(0, 0.01); heatmaps bias = -log((1-p)/p).
    bias_value = -math.log((1.0 - PRIOR_PROB) / PRIOR_PROB)
    weight = 0.01 * jax.random.normal(key, (num_kps, in_channels),
                                      dtype=jnp.float32)            # (K, C)
    bias = jnp.full((num_kps,), bias_value, dtype=jnp.float32)
    return weight, bias


# ------------------------------ forward (eval) -------------------------------
def heatmaps_forward(feature_nchw, weight, bias, im_hw, num_kps=NUM_KPS,
                     tile_rows=None):
    """Inference-mode forward of Heatmaps (targets=None)."""
    # TODO(synk): DLv3Plus (ASPP + decoder) is an external module; the head is
    # stood in by its final 1x1 `heatmaps` conv with the init from __init__.
    # TODO(synk): training branch (keypoint label-map targets + SigmoidFocalLoss)
    # not implemented; only the eval branch of forward() is reproduced.
    heat, mask = heatmaps_head(feature_nchw, weight, bias,
                               tile_rows=tile_rows)          # one fused kernel
    stride = im_hw[0] // heat.shape[2]

    # torch.nonzero is dynamic-shape -> extracted host-side from the int8 mask.
    mask_np = np.asarray(jax.device_get(mask))
    coords = np.stack(np.nonzero(mask_np), axis=1)           # cols: [n, k, y, x]

    results = []
    for im_i in range(feature_nchw.shape[0]):
        coords_per_im = coords[coords[:, 0] == im_i]
        results_per_type = []
        for type_i in range(num_kps):
            c = coords_per_im[coords_per_im[:, 1] == type_i][:, -2:]
            c = c.astype(np.float32) * stride
            results_per_type.append(c[:, [1, 0]])            # (x, y) order
        results.append(results_per_type)
    return results, stride, heat


if __name__ == "__main__":
    key = jax.random.PRNGKey(0)
    k_feat, k_w = jax.random.split(key)
    N, C, H, W = 2, 32, 16, 16
    feature = jax.random.normal(k_feat, (N, C, H, W), dtype=jnp.float32)  # NCHW
    weight, bias = init_params(k_w, C)
    im_hw = (64, 64)                                         # image H,W -> stride 4

    # Run fused kernel with 2 spatial tiles (tile_rows=8 -> tile_hw=128) to
    # exercise the tiled path incl. the cross-tile vertical pooling halo.
    heat, mask = heatmaps_head(feature, weight, bias, tile_rows=8)
    jax.block_until_ready((heat, mask))

    # Heat reference in f32 (kernel uses bf16 inputs -> relaxed tolerance).
    heat_ref = (jnp.einsum('nchw,kc->nkhw', feature, weight,
                           precision=lax.Precision.HIGHEST)
                + bias[None, :, None, None])
    assert np.allclose(np.asarray(heat), np.asarray(heat_ref),
                       rtol=2e-2, atol=2e-2)

    # Mask reference computed from the kernel's own heat output, so the
    # pooling / halo / threshold logic is checked exactly (no bf16 ambiguity).
    pooled_ref = lax.reduce_window(heat, -jnp.inf, lax.max,
                                   window_dimensions=(1, 1, 3, 3),
                                   window_strides=(1, 1, 1, 1),
                                   padding=((0, 0), (0, 0), (1, 1), (1, 1)))
    mask_ref = ((pooled_ref == heat) &
                (heat > jnp.float32(LOGIT_THRESH))).astype(jnp.int8)
    assert np.array_equal(np.asarray(mask), np.asarray(mask_ref))

    # Full eval-branch forward (matches PyTorch return structure); auto tiling.
    results, stride, heat_out = heatmaps_forward(feature, weight, bias, im_hw)
    jax.block_until_ready(heat_out)
    assert heat_out.shape == (N, NUM_KPS, H, W)
    assert stride == 4
    assert len(results) == N and len(results[0]) == NUM_KPS
    print("KERNEL_OK")
</pallas_src>

<mosaic_0001>
module attributes {stable_mosaic.version = 11 : i64} {
  func.func @_fused_head_kernel(%arg0: i32, %arg1: i32, %arg2: memref<1x32x128xbf16, #tpu.memory_space<vmem>>, %arg3: memref<17x32xbf16, #tpu.memory_space<vmem>>, %arg4: memref<17x1xf32, #tpu.memory_space<vmem>>, %arg5: memref<2x128xf32, #tpu.memory_space<vmem>>, %arg6: memref<2x256xf32, #tpu.memory_space<vmem>>, %arg7: memref<1x17x256xf32, #tpu.memory_space<vmem>>, %arg8: memref<1x17x256xi8, #tpu.memory_space<vmem>>, %arg9: memref<17x256xf32, #tpu.memory_space<vmem>>) attributes {dimension_semantics = [#tpu.dimension_semantics<parallel>, #tpu.dimension_semantics<arbitrary>], iteration_bounds = array<i64: 2, 2>, scalar_prefetch = 0 : i64, scratch_operands = 1 : i64, tpu.core_type = #tpu.core_type<tc>, window_params = [{transform_indices = @transform_0, window_bounds = array<i64: 1, 32, 128>}, {pipeline_mode = #tpu.pipeline_mode<synchronous>, transform_indices = @transform_1, window_bounds = array<i64: 17, 32>}, {pipeline_mode = #tpu.pipeline_mode<synchronous>, transform_indices = @transform_2, window_bounds = array<i64: 17, 1>}, {pipeline_mode = #tpu.pipeline_mode<synchronous>, transform_indices = @transform_3, window_bounds = array<i64: 2, 128>}, {pipeline_mode = #tpu.pipeline_mode<synchronous>, transform_indices = @transform_4, window_bounds = array<i64: 2, 256>}, {transform_indices = @transform_5, window_bounds = array<i64: 1, 17, 256>}, {transform_indices = @transform_6, window_bounds = array<i64: 1, 17, 256>}]} {
    %c128_i32 = arith.constant 128 : i32
    %0 = arith.muli %arg1, %c128_i32 : i32
    %1 = tpu.assume_multiple %0, 128 : i32
    %c0 = arith.constant 0 : index
    %c0_0 = arith.constant 0 : index
    %2 = vector.load %arg3[%c0, %c0_0] : memref<17x32xbf16, #tpu.memory_space<vmem>>, vector<17x32xbf16>
    %c0_1 = arith.constant 0 : index
    %c0_2 = arith.constant 0 : index
    %c0_3 = arith.constant 0 : index
    %3 = vector.load %arg2[%c0_1, %c0_2, %c0_3] : memref<1x32x128xbf16, #tpu.memory_space<vmem>>, vector<1x32x128xbf16>
    %4 = vector.shape_cast %3 : vector<1x32x128xbf16> to vector<32x128xbf16>
    %cst = arith.constant dense<0.000000e+00> : vector<17x128xf32>
    %5 = tpu.matmul %2, %4, %cst {dimension_numbers = #tpu.dot_dimension_numbers<[1], [0], [0], [1], [0, 0, 1, 1], [], []>} : vector<17x32xbf16>, vector<32x128xbf16>, vector<17x128xf32> -> vector<17x128xf32>
    %c0_4 = arith.constant 0 : index
    %c0_5 = arith.constant 0 : index
    %6 = vector.load %arg4[%c0_4, %c0_5] : memref<17x1xf32, #tpu.memory_space<vmem>>, vector<17x1xf32>
    %7 = vector.broadcast %6 : vector<17x1xf32> to vector<17x128xf32>
    %8 = arith.addf %5, %7 : vector<17x128xf32>
    %c0_6 = arith.constant 0 : index
    %c0_7 = arith.constant 0 : index
    %9 = arith.index_cast %1 : i32 to index
    %10 = vector.load %arg7[%c0_6, %c0_7, %9] : memref<1x17x256xf32, #tpu.memory_space<vmem>>, vector<1x17x128xf32>
    %11 = vector.shape_cast %10 : vector<1x17x128xf32> to vector<17x128xf32>
    %12 = vector.shape_cast %8 : vector<17x128xf32> to vector<1x17x128xf32>
    tpu.vector_store %arg7[%c0_6, %c0_7, %9], %12 {strides = array<i32>} : memref<1x17x256xf32, #tpu.memory_space<vmem>>, vector<1x17x128xf32>,
    %c0_8 = arith.constant 0 : index
    %c0_9 = arith.constant 0 : index
    %13 = vector.load %arg5[%c0_8, %c0_9] : memref<2x128xf32, #tpu.memory_space<vmem>>, vector<2x128xf32>
    %c127_i32 = arith.constant 127 : i32
    %14 = tpu.dynamic_rotate %8 by %c127_i32 dim 1 : vector<17x128xf32>, i32 -> vector<17x128xf32>
    %15 = vector.extract_strided_slice %13 {offsets = [0, 0], sizes = [1, 128], strides = [1, 1]} : vector<2x128xf32> to vector<1x128xf32>
    %16 = vector.broadcast %15 : vector<1x128xf32> to vector<17x128xf32>
    %17 = arith.addf %14, %16 : vector<17x128xf32>
    %c1_i32 = arith.constant 1 : i32
    %18 = tpu.dynamic_rotate %8 by %c1_i32 dim 1 : vector<17x128xf32>, i32 -> vector<17x128xf32>
    %19 = vector.extract_strided_slice %13 {offsets = [1, 0], sizes = [1, 128], strides = [1, 1]} : vector<2x128xf32> to vector<1x128xf32>
    %20 = vector.broadcast %19 : vector<1x128xf32> to vector<17x128xf32>
    %21 = arith.addf %18, %20 : vector<17x128xf32>
    %22 = arith.maximumf %17, %21 : vector<17x128xf32>
    %23 = arith.maximumf %8, %22 : vector<17x128xf32>
    %c0_10 = arith.constant 0 : index
    %24 = arith.index_cast %1 : i32 to index
    %25 = vector.load %arg9[%c0_10, %24] : memref<17x256xf32, #tpu.memory_space<vmem>>, vector<17x128xf32>
    tpu.vector_store %arg9[%c0_10, %24], %23 {strides = array<i32>} : memref<17x256xf32, #tpu.memory_space<vmem>>, vector<17x128xf32>,
    %c1_i32_11 = arith.constant 1 : i32
    %26 = arith.cmpi eq, %arg1, %c1_i32_11 : i32
    %27 = arith.extui %26 : i1 to i32
    %c0_i32 = arith.constant 0 : i32
    %28 = arith.cmpi ne, %27, %c0_i32 : i32
    scf.if %28 {
      %c0_12 = arith.constant 0 : index
      %c0_13 = arith.constant 0 : index
      %c0_14 = arith.constant 0 : index
      %29 = vector.load %arg7[%c0_12, %c0_13, %c0_14] : memref<1x17x256xf32, #tpu.memory_space<vmem>>, vector<1x17x256xf32>
      %30 = vector.shape_cast %29 : vector<1x17x256xf32> to vector<17x256xf32>
      %c0_15 = arith.constant 0 : index
      %c0_16 = arith.constant 0 : index
      %31 = vector.load %arg9[%c0_15, %c0_16] : memref<17x256xf32, #tpu.memory_space<vmem>>, vector<17x256xf32>
      %c0_17 = arith.constant 0 : index
      %c0_18 = arith.constant 0 : index
      %32 = vector.load %arg6[%c0_17, %c0_18] : memref<2x256xf32, #tpu.memory_space<vmem>>, vector<2x256xf32>
      %c240_i32 = arith.constant 240 : i32
      %33 = tpu.dynamic_rotate %31 by %c240_i32 dim 1 : vector<17x256xf32>, i32 -> vector<17x256xf32>
      %34 = vector.extract_strided_slice %32 {offsets = [0, 0], sizes = [1, 256], strides = [1, 1]} : vector<2x256xf32> to vector<1x256xf32>
      %35 = vector.broadcast %34 : vector<1x256xf32> to vector<17x256xf32>
      %36 = arith.addf %33, %35 : vector<17x256xf32>
      %c16_i32 = arith.constant 16 : i32
      %37 = tpu.dynamic_rotate %31 by %c16_i32 dim 1 : vector<17x256xf32>, i32 -> vector<17x256xf32>
      %38 = vector.extract_strided_slice %32 {offsets = [1, 0], sizes = [1, 256], strides = [1, 1]} : vector<2x256xf32> to vector<1x256xf32>
      %39 = vector.broadcast %38 : vector<1x256xf32> to vector<17x256xf32>
      %40 = arith.addf %37, %39 : vector<17x256xf32>
      %41 = arith.maximumf %36, %40 : vector<17x256xf32>
      %42 = arith.maximumf %31, %41 : vector<17x256xf32>
      %43 = arith.cmpf oeq, %42, %30 : vector<17x256xf32>
      %cst_19 = arith.constant -2.94443893 : f32
      %44 = vector.broadcast %cst_19 : f32 to vector<17x256xf32>
      %45 = arith.cmpf ogt, %30, %44 : vector<17x256xf32>
      %46 = arith.andi %43, %45 : vector<17x256xi1>
      %47 = arith.extui %46 : vector<17x256xi1> to vector<17x256xi8>
      %c0_20 = arith.constant 0 : index
      %c0_21 = arith.constant 0 : index
      %c0_22 = arith.constant 0 : index
      %48 = vector.load %arg8[%c0_20, %c0_21, %c0_22] : memref<1x17x256xi8, #tpu.memory_space<vmem>>, vector<1x17x256xi8>
      %49 = vector.shape_cast %48 : vector<1x17x256xi8> to vector<17x256xi8>
      %50 = vector.shape_cast %47 : vector<17x256xi8> to vector<1x17x256xi8>
      tpu.vector_store %arg8[%c0_20, %c0_21, %c0_22], %50 {strides = array<i32>} : memref<1x17x256xi8, #tpu.memory_space<vmem>>, vector<1x17x256xi8>,
    } else {
    }
    return
  }
  func.func @transform_0(%arg0: i32, %arg1: i32) -> (i32, i32, i32) {
    %c0_i32 = arith.constant 0 : i32
    %c0_i32_0 = arith.constant 0 : i32
    return %arg0, %c0_i32, %arg1 : i32, i32, i32
  }
  func.func @transform_1(%arg0: i32, %arg1: i32) -> (i32, i32) {
    %c0_i32 = arith.constant 0 : i32
    %c0_i32_0 = arith.constant 0 : i32
    %c0_i32_1 = arith.constant 0 : i32
    return %c0_i32, %c0_i32_0 : i32, i32
  }
  func.func @transform_2(%arg0: i32, %arg1: i32) -> (i32, i32) {
    %c0_i32 = arith.constant 0 : i32
    %c0_i32_0 = arith.constant 0 : i32
    %c0_i32_1 = arith.constant 0 : i32
    return %c0_i32, %c0_i32_0 : i32, i32
  }
  func.func @transform_3(%arg0: i32, %arg1: i32) -> (i32, i32) {
    %c0_i32 = arith.constant 0 : i32
    %c0_i32_0 = arith.constant 0 : i32
    %c0_i32_1 = arith.constant 0 : i32
    return %c0_i32, %c0_i32_0 : i32, i32
  }
  func.func @transform_4(%arg0: i32, %arg1: i32) -> (i32, i32) {
    %c0_i32 = arith.constant 0 : i32
    %c0_i32_0 = arith.constant 0 : i32
    %c0_i32_1 = arith.constant 0 : i32
    return %c0_i32, %c0_i32_0 : i32, i32
  }
  func.func @transform_5(%arg0: i32, %arg1: i32) -> (i32, i32, i32) {
    %c0_i32 = arith.constant 0 : i32
    %c0_i32_0 = arith.constant 0 : i32
    %c0_i32_1 = arith.constant 0 : i32
    return %arg0, %c0_i32, %c0_i32_0 : i32, i32, i32
  }
  func.func @transform_6(%arg0: i32, %arg1: i32) -> (i32, i32, i32) {
    %c0_i32 = arith.constant 0 : i32
    %c0_i32_0 = arith.constant 0 : i32
    %c0_i32_1 = arith.constant 0 : i32
    return %arg0, %c0_i32, %c0_i32_0 : i32, i32, i32
  }
}

</mosaic_0001>

<bundles_post_ra>
// kernel: tpu_custom_call.1
= control target key start
LH: loop header
LB: loop body
LE: loop exit
PB: predicated region body
PF: predicated region fallthrough
CT: control target
= control target key end

     0   :  { %s1441_s0 = inlined_call_operand.hbm [shape: bf16[2,32,256], index: 0, kind: input, shape index: {}]   ;;  %s1442_s1 = inlined_call_operand.vmem [shape: bf16[17,32], index: 1, kind: input, shape index: {}]   ;;  %s1443_s2 = inlined_call_operand.vmem [shape: f32[17,1], index: 2, kind: input, shape index: {}]   ;;  %s1444_s3 = inlined_call_operand.vmem [shape: f32[2,128], index: 3, kind: input, shape index: {}]   ;;  %s1445_s4 = inlined_call_operand.vmem [shape: f32[2,256], index: 4, kind: input, shape index: {}]   ;;  %s1446_s5 = inlined_call_operand.vmem [shape: f32[2,17,256], index: 5, kind: output, shape index: {0}]   ;;  %s1447_s6 = inlined_call_operand.hbm [shape: s8[2,17,256], index: 6, kind: output, shape index: {1}]  }
   0x1   :  { %1454 = sst [smem:[#allocation14_spill]] %s1445_s4 }
   0x2   :  { %1455 = sst [smem:[#allocation15_spill]] %s1447_s6 }
   0x3   :  { %12 = vsyncpa [#allocation4], 0 }
   0x4   :  { %14 = vsyncpa [#allocation4 + $0x1], 0 }
   0x5   :  { %15 = vsyncpa [#allocation5], 0 }
   0x6   :  { %17 = vsyncpa [#allocation5 + $0x1], 0  ;;  %s1107_s21 = smov 0   ;;  %s1109_s22 = smov 0  }
   0x7   :  { %s1111_s23 = smov 0   ;;  %s1113_s24 = smov 0  }
   0x8   :  { %s1115_s25 = smov 0   ;;  %s1117_s26 = smov 0  }
   0x9   :  { %s1119_s27 = smov 0   ;;  %s1121_s28 = smov 0  }
   0xa   :  { %s1123_s29 = smov 0   ;;  %s1125_s30 = smov 0  }
   0xb   :  { %s1127_s7 = smov 0  }
   0xc LB: > { %1456 = sst [smem:[#allocation9_spill]] %s1037_s26  ;;  %s752_s8 = sadd.s32 4294967295, %s1057_s7   ;;  %s1057_s7 = sphi %s1127_s7, %s23_s7   ;;  %s1053_s30 = sphi %s1125_s30, %s1490_s30   ;;  %s1049_s29 = sphi %s1123_s29, %s1489_s29   ;;  %s1045_s28 = sphi %s1121_s28, %s1488_s28   ;;  %s1041_s27 = sphi %s1119_s27, %s1487_s27   ;;  %s1037_s26 = sphi %s1117_s26, %s1479_s26   ;;  %s1033_s25 = sphi %s1115_s25, %s1486_s25   ;;  %s1029_s24 = sphi %s1113_s24, %s1485_s24   ;;  %s1025_s23 = sphi %s1111_s23, %s1484_s23   ;;  %s1021_s22 = sphi %s1109_s22, %s1483_s22   ;;  %s1017_s21 = sphi %s1107_s21, %s1482_s21  }
   0xd   : > { %s753_s9 = sadd.s32 4294967294, %s1057_s7   ;;  %s32_s10 = sadd.s32 1, %s1049_s29 }
   0xe   : > { %s35_s11 = sadd.s32 1, %s1053_s30  ;;  %p33_p0 = scmp.ge.s32.totalorder %s32_s10, 2 }
   0xf   : > { %s44_s12 = sadd.s32 1, %s1037_s26  ;;  %p51_p1 = scmp.ne.s32.totalorder %s1037_s26, %s1033_s25 }
  0x10   : > { %p52_p2 = scmp.eq.s32.totalorder %s1057_s7, 0  ;;  %s1492_s10 = smov (%p33_p0, %s32_s10), 0 }
  0x11   : > { %1457 = sst [smem:[#allocation10_spill]] %s1492_s10  ;;  %s1494_s11 = smov (!%p33_p0, %s35_s11), %s1053_s30 }
  0x12   : > { %s40_s13 = ssub.s32 %s1049_s29, %s1492_s10  ;;  %p1173_p3 = por %p52_p2, %p51_p1 }
  0x13   : > { %p37_p4 = scmp.ge.s32.totalorder %s1494_s11, 2  ;;  %p57_p5 = scmp.ne.s32.totalorder %s1033_s25, %s1029_s24 }
  0x14   : > { %p58_p6 = scmp.eq.s32.totalorder %s752_s8, 0  ;;  %s180_s15 = sadd.s32 1, %s1025_s23 }
  0x15   : > { %s1496_s11 = smov (%p37_p4, %s1494_s11), 0  ;;  %p190_p8 = scmp.ne.s32.totalorder %s1025_s23, %s1021_s22 }
  0x16   : > { %1459 = sst [smem:[#allocation11_spill]] %s1496_s11  ;;  %p1181_p7 = por %p58_p6, %p57_p5 }
  0x17   : > { %s39_s17 = ssub.s32 %s1053_s30, %s1496_s11  ;;  %p191_p9 = scmp.eq.s32.totalorder %s752_s8, 3 }
  0x18   : > { %s41_s18 = sor.u32 %s40_s13, %s39_s17  ;;  %p178_p10 = scmp.eq.s32.totalorder %s39_s17, 0 }
  0x19   : > { %p42_p11 = scmp.eq.s32.totalorder %s41_s18, 0  ;;  %p1189_p12 = por %p191_p9, %p190_p8 }
  0x1a   : > { %s1194_s20 = scalar_select %p178_p10, %s1025_s23, %s180_s15  }
  0x1b   : > { %s1461_s19 = scalar_select %p1189_p12, 1, 0 }
  0x1c   : > { %s1197_s24 = scalar_select %p42_p11, %s1037_s26, %s44_s12  }
  0x1d   : > { %1462 = sst [smem:[#allocation12_spill]] %s1461_s19  ;;  %p196_p13 = scmp.ne.s32.totalorder %s1021_s22, %s1017_s21 }
  0x1e   : > { %1463 = sst [smem:[#allocation13_spill]] %s1197_s24  ;;  %p197_p0 = scmp.eq.s32.totalorder %s753_s9, 3 }
  0x1f   : > { %p802_p1 = scmp.lt.s32.totalorder %s1057_s7, 4  ;;  %s229_s8 = sand.u32 1, %s1037_s26  }
  0x20   : > { %p1202_p2 = por %p197_p0, %p196_p13  ;;  %s756_s13 = sshll.u32 %s229_s8, 4 }
  0x21   : > { %s757_s17 = sshll.u32 %s1053_s30, 3  ;;  %s233_s11 = scalar_lea.vmem [#allocation3], %s756_s13 }
  0x22   : > { %s238_s18 = sadd.s32 %s1049_s29, %s757_s17  ;;  %s241_s6 = sshll.u32 %s233_s11, 4  ;;  %s242_s6 = int_to_ptr.vmem [resolvable:$true] %s241_s6 }
  0x23   : > { %s758_s4 = sshll.u32 %s238_s18, 6  ;;  %p1214_p4 = pnand %p802_p1, %p1173_p3 }
  0x24   : > { %s240_s12 = scalar_lea.hbm %s1441_s0, %s758_s4  ;;  %s230_s24 = scalar_lea.sflag [#allocation4], %s229_s8 }
  0x25   : > { %p911_p5 = pneg %p1214_p4  ;;  %s922_s26 = scalar_lea.vmem %s242_s6, 256 }
  0x26   : > { %p923_p6 = scmp.ne.s32.totalorder %s242_s6, %s922_s26  ;;  %s1059_s11 = smov [#allocation3]  }
  0x27   : > { %s927_s13 = sshll.u32 %s1059_s11, 4  ;;  %s928_s13 = int_to_ptr.vmem [resolvable:$false] %s927_s13 }
  0x28   : > { %p925_p8 = pnand %p923_p6, %p911_p5  ;;  %s929_s17 = scalar_lea.vmem %s928_s13, 512 }
  0x29   : > { %p930_p10 = scmp.lt.s32.totalorder %s242_s6, %s928_s13  ;;  %p931_p11 = scmp.lt.s32.totalorder %s929_s17, %s922_s26 }
  0x2a   : > { %p926_p9 = pneg %p925_p8 }
  0x2b   : > { %p932_p13 = por %p931_p11, %p930_p10 }
  0x2d   : > { %p933_p0 = pnand %p932_p13, %p926_p9 }
  0x2f   : > { %936 = shalt.err (!%p933_p0)
}
  0x30   : > { %s1060_s4 = smov 128   ;;  %s1061_s14 = smov 64  }
  0x31   : > { %s1062_s19 = smov 4   ;;  %p759_p3 = scmp.ge.s32.totalorder %s1057_s7, 1 }
  0x32   : > { %797 = dma.hbm_to_vmem [thread:$0]  (!%p1214_p4), %s240_s12, 256, %s242_s6, %s230_s24, %s1060_s4, %s1061_s14, %s1062_s19  }
  0x33   : > { %p249_p1 = scmp.lt.s32.totalorder %s1057_s7, 5 }
  0x35   : > { %p250_p5 = pnand %p759_p3, %p249_p1 }
  0x36   : > { %s255_s8 = sand.u32 (!%p250_p5), 1, %s1033_s25  }
  0x37   : > { %253 = sbr.rel (%p250_p5) target bundleno = 593 (0x251), region = 40  ;;  %s760_s18 = sshll.u32 (!%p250_p5), %s255_s8, 4 }
  0x38   : > { %s256_s26 = scalar_lea.sflag (!%p250_p5), [#allocation4], %s255_s8  ;;  %s259_s15 = scalar_lea.vmem (!%p250_p5), [#allocation3], %s760_s18 }
  0x3c   : > { %1008 = dma.done.wait (%p1181_p7), %s256_s26, 256  }
  0x3d   : > { %1010 = vsyncadd (%p1181_p7), %s256_s26, 4294967040  ;;  %s290_s11 = sand.u32 1, %s1021_s22   ;;  %v1063_v0 = vmov 0   ;;  %v905_v1 = vld [vmem:[%s259_s15 + $0x8] sm:$0xff]   ;;  %v906_v2 = vld [vmem:[%s259_s15] sm:$0xff]   ;;  %vm347_vm0 = vcmask 261120   ;;  %v416_v18 = vlaneseq }
  0x3e   : > { %s1232_s6 = smul.u32 12, %s290_s11  ;;  %903 = vset.pattern.permute.xlu0 %v1063_v0  ;;  %904 = vset.pattern.permute.xlu1 %v1063_v0  ;;  %v907_v3 = vld [vmem:[%s1442_s1] sm:$0xff]   ;;  %v311_v5 = vld [vmem:[%s1443_s2 + $0x10] sm:$0x1]  ;;  %v310_v7 = vld [vmem:[%s1443_s2 + $0x8] sm:$0xff]  ;;  %p293_p7 = scmp.lt.s32.totalorder %s1045_s28, 1 }
  0x3f   : > { %779 = vmatprep.subr.bf16.mxu0 %v905_v1  ;;  %v309_v4 = vld [vmem:[%s1443_s2] sm:$0xff]  ;;  %783 = vmatprep.mubr.msk.bf16.mxu0 %vm347_vm0, %v907_v3  ;;  %v908_v6 = vld [vmem:[%s1442_s1 + $0x8] ss:$0 sps:$4 sm:$0x11]   ;;  %s762_s26 = sshll.u32 %s1041_s27, 7  ;;  %s1064_s4 = smov 127  }
  0x40   : > { %780 = vmatpush3.bf16.msra.mxu0 %v905_v1  ;;  %314 = vperm.xlu0 %903, %v309_v4   ;;  %s294_s18 = scalar_select %p293_p7, %s1045_s28, 1  ;;  %v1263_v19 = vshrl.u32 %v416_v18, 7  ;;  %v409_v22 = vld [vmem:[%s1444_s3] sm:$0x3] }
  0x41   : > { %781 = vmatprep.subr.bf16.mxu0 %v906_v2  ;;  %324 = vperm.xlu1 %904, %v311_v5   ;;  %s1252_s24 = sshra.s32 %s762_s26, 7  ;;  %s1065_s14 = smov 1  }
  0x42   : > { %s788_s15 = smul.u32 48, %s294_s18  ;;  %s769_s13 = sshll.u32 %s1252_s24, 3  ;;  %v1266_v20 = vsub.s32 1, %v1263_v19  ;;  %v1269_v21 = vsub.s32 0, %v1263_v19 }
  0x43   : > { %s443_s18 = scalar_lea.vmem [#allocation2], %s769_s13  ;;  %s1279_s26 = scalar_lea.vmem [#allocation6], %s1232_s6 }
  0x44   : > { %782 = vmatpush3.bf16.msra.mxu0 %v906_v2  ;;  %319 = vperm.xlu0 %903, %v310_v7   ;;  %s1257_s9 = scalar_lea.vmem %s1446_s5, %s788_s15  ;;  %v432_v24 = vrot.slane %v409_v22, %v1266_v20  ;;  %v419_v26 = vrot.slane %v409_v22, %v1269_v21  ;;  %p771_p4 = scmp.ne.s32.totalorder %s1041_s27, 1 }
  0x45   : > { %s405_s17 = scalar_lea.vmem %s1257_s9, %s769_s13  ;;  %s1066_s15 = smov (!%p771_p4), 112  }
  0x46   : > { %s1067_s27 = smov (!%p771_p4), 16   ;;  %s1466_s12 = sld [smem:[#allocation14_spill]] (!%p771_p4) }
  0x47   : > { %784 = vmatmul.mubr.msk.bf16.vlgmr.msra.gmra.mxu0 %vm347_vm0, %v908_v6 }
  0xbb   : > { %v315_v9 = vpop.permute.xlu0 %314 }
  0xbc   : > { %v325_v8 = vpop.permute.xlu1 %324 }
  0xbf   : > { %v320_v15 = vpop.permute.xlu0 %319 }
 0x107   : > { %v785_v10 = vpop.f32.mrf.mxu0 }
 0x108   : > { %v397_v11 = vadd.f32 %v785_v10, %v325_v8 }
 0x109   : > { %v388_v12 = vpop.f32.mrf.mxu0 }
 0x10a   : > { %408 = vst [vmem:[%s405_s17 + $0x20] sm:$0x1] %v397_v11  ;;  %v389_v13 = vadd.f32 %v388_v12, %v315_v9  ;;  %414 = vrot.lane.b32.xlu1 %v397_v11, %s1064_s4 }
 0x10b   : > { %v786_v14 = vpop.f32.mrf.mxu0 }
 0x10c   : > { %406 = vst [vmem:[%s405_s17] sm:$0xff] %v389_v13  ;;  %423 = vrot.lane.b32.xlu0 %v389_v13, %s1065_s14 }
 0x10d   : > { %v391_v16 = vpop.f32.mrf.mxu0 }
 0x10e   : > { %v392_v17 = vadd.f32 %v391_v16, %v320_v15  ;;  %410 = vrot.lane.b32.xlu1 %v389_v13, %s1064_s4 }
 0x110   : > { %407 = vst [vmem:[%s405_s17 + $0x10] sm:$0xff] %v392_v17  ;;  %412 = vrot.lane.b32.xlu0 %v392_v17, %s1064_s4 }
 0x112   : > { %425 = vrot.lane.b32.xlu1 %v392_v17, %s1065_s14 }
 0x114   : > { %427 = vrot.lane.b32.xlu0 %v397_v11, %s1065_s14 }
 0x17c   : > { %v415_v23 = vpop.permute.xlu1 %414 }
 0x17d   : > { %v422_v37 = vadd.f32 %v419_v26, %v415_v23 }
 0x17e   : > { %v424_v25 = vpop.permute.xlu0 %423 }
 0x17f   : > { %v433_v28 = vadd.f32 %v432_v24, %v424_v25 }
 0x180   : > { %v411_v27 = vpop.permute.xlu1 %410 }
 0x181   : > { %v420_v29 = vadd.f32 %v419_v26, %v411_v27 }
 0x182   : > { %v413_v30 = vpop.permute.xlu0 %412 }
 0x183   : > { %v436_v31 = vmax.f32 %v420_v29, %v433_v28  ;;  %v421_v34 = vadd.f32 %v419_v26, %v413_v30 }
 0x184   : > { %v426_v32 = vpop.permute.xlu1 %425 }
 0x185   : > { %v439_v33 = vmax.f32 %v389_v13, %v436_v31  ;;  %v434_v35 = vadd.f32 %v432_v24, %v426_v32 }
 0x186   : > { %v428_v36 = vpop.permute.xlu0 %427 }
 0x187   : > { %444 = vst [vmem:[%s443_s18] sm:$0xff] %v439_v33  ;;  %v437_v38 = vmax.f32 %v421_v34, %v434_v35  ;;  %v435_v39 = vadd.f32 %v432_v24, %v428_v36 }
 0x189   : > { %v440_v40 = vmax.f32 %v392_v17, %v437_v38  ;;  %v438_v41 = vmax.f32 %v422_v37, %v435_v39  ;;  %450 = sbr.rel (%p771_p4) target bundleno = 568 (0x238), region = 48 }
 0x18b   : > { %445 = vst [vmem:[%s443_s18 + $0x10] sm:$0xff] %v440_v40  ;;  %v441_v42 = vmax.f32 %v397_v11, %v438_v41 }
 0x18d   : > { %446 = vst [vmem:[%s443_s18 + $0x20] sm:$0x1] %v441_v42 }
 0x18e   : > { %v492_v53 = vsub.s32 2, %v1263_v19  ;;  %v535_v54 = vsub.s32 3, %v1263_v19  ;;  %v463_v55 = vld [vmem:[%s1466_s12] sm:$0xf]  ;;  %v477_v56 = vand.u32 127, %v416_v18  ;;  %v452_v30 = vld [vmem:[%s1257_s9 + $0x8] sm:$0xff] }
 0x18f   : > { %v489_v59 = vrot.slane %v463_v55, %v1269_v21  ;;  %v532_v61 = vrot.slane %v463_v55, %v1266_v20  ;;  %v451_v25 = vld [vmem:[%s1257_s9] sm:$0xff]  ;;  %v456_v40 = vld [vmem:[%s1257_s9 + $0x28] sm:$0x1]  ;;  %vm572_vm6 = vcmp.gt.f32.partialorder %v452_v30, -2.944439 }
 0x190   : > { %v493_v60 = vrot.slane %v463_v55, %v492_v53  ;;  %v536_v62 = vrot.slane %v463_v55, %v535_v54  ;;  %vm478_vm1 = vcmp.lt.s32.totalorder %v477_v56, 112  ;;  %vm522_vm2 = vcmp.lt.s32.totalorder %v477_v56, 16  ;;  %v455_v37 = vld [vmem:[%s1257_s9 + $0x20] sm:$0x1] }
 0x191   : > { %v499_v1 = vrot.slane %v489_v59, %v1269_v21  ;;  %v542_v3 = vrot.slane %v532_v61, %v1266_v20  ;;  %vm571_vm4 = vcmp.gt.f32.partialorder %v451_v25, -2.944439  ;;  %vm575_vm7 = vcmp.gt.f32.partialorder %v455_v37, -2.944439 }
 0x192   : > { %v503_v2 = vrot.slane %v493_v60, %v1269_v21  ;;  %v546_v4 = vrot.slane %v536_v62, %v1266_v20  ;;  %vm576_vm9 = vcmp.gt.f32.partialorder %v456_v40, -2.944439  ;;  %v1469_v55 = vmov 0 }
 0x194   : > { %v1282_v43 = vld [vmem:[#allocation2 + $0x20] sm:$0x1]  ;;  %v1288_v45 = vld [vmem:[#allocation2 + $0x8] sm:$0xff]  ;;  %v1290_v46 = vld [vmem:[#allocation2 + $0x10] sm:$0xff] }
 0x195   : > { %v1284_v44 = vld [vmem:[#allocation2] sm:$0xff]  ;;  %468 = vrot.lane.b32.xlu1 %v1282_v43, %s1066_s15  ;;  %v1294_v47 = vld [vmem:[#allocation2 + $0x28] sm:$0x1]  ;;  %v1296_v48 = vld [vmem:[#allocation2 + $0x18] sm:$0xff] }
 0x196   : > { %464 = vrot.lane.b32.xlu0 %v1284_v44, %s1066_s15 }
 0x199   : > { %470 = vrot.lane.b32.xlu1 %v1288_v45, %s1066_s15 }
 0x19a   : > { %466 = vrot.lane.b32.xlu0 %v1290_v46, %s1066_s15 }
 0x19d   : > { %474 = vrot.lane.b32.xlu1 %v1294_v47, %s1066_s15 }
 0x19e   : > { %472 = vrot.lane.b32.xlu0 %v1296_v48, %s1066_s15 }
 0x1a1   : > { %512 = vrot.lane.b32.xlu1 %v1290_v46, %s1067_s27 }
 0x1a2   : > { %510 = vrot.lane.b32.xlu0 %v1284_v44, %s1067_s27 }
 0x1a5   : > { %516 = vrot.lane.b32.xlu1 %v1288_v45, %s1067_s27 }
 0x1a6   : > { %514 = vrot.lane.b32.xlu0 %v1282_v43, %s1067_s27 }
 0x1a9   : > { %520 = vrot.lane.b32.xlu1 %v1294_v47, %s1067_s27 }
 0x1aa   : > { %518 = vrot.lane.b32.xlu0 %v1296_v48, %s1067_s27 }
 0x207   : > { %v469_v49 = vpop.permute.xlu1 %468 }
 0x208   : > { %v465_v50 = vpop.permute.xlu0 %464 }
 0x20b   : > { %v471_v51 = vpop.permute.xlu1 %470 }
 0x20c   : > { %v467_v52 = vpop.permute.xlu0 %466  ;;  %v479_v5 = vsel %vm478_vm1, %v465_v50, %v471_v51  ;;  %v482_v6 = vsel %vm478_vm1, %v471_v51, %v465_v50 }
 0x20d   : > { %v504_v13 = vadd.f32 %v499_v1, %v479_v5  ;;  %v505_v14 = vadd.f32 %v503_v2, %v482_v6 }
 0x20f   : > { %v475_v57 = vpop.permute.xlu1 %474 }
 0x210   : > { %v473_v58 = vpop.permute.xlu0 %472  ;;  %v481_v9 = vsel %vm478_vm1, %v469_v49, %v475_v57  ;;  %v484_v10 = vsel %vm478_vm1, %v475_v57, %v469_v49 }
 0x211   : > { %v480_v17 = vsel %vm478_vm1, %v467_v52, %v473_v58  ;;  %v483_v18 = vsel %vm478_vm1, %v473_v58, %v467_v52  ;;  %v508_v19 = vadd.f32 %v499_v1, %v481_v9  ;;  %v509_v20 = vadd.f32 %v503_v2, %v484_v10  ;;  %v453_v52 = vld [vmem:[%s1257_s9 + $0x10] sm:$0xff] }
 0x212   : > { %v506_v35 = vadd.f32 %v499_v1, %v480_v17  ;;  %v507_v36 = vadd.f32 %v503_v2, %v483_v18  ;;  %vm573_vm0 = vcmp.gt.f32.partialorder %v453_v52, -2.944439 }
 0x213   : > { %v513_v63 = vpop.permute.xlu1 %512 }
 0x214   : > { %v511_v0 = vpop.permute.xlu0 %510 }
 0x217   : > { %v517_v7 = vpop.permute.xlu1 %516 }
 0x218   : > { %v515_v8 = vpop.permute.xlu0 %514  ;;  %v523_v11 = vsel %vm522_vm2, %v511_v0, %v517_v7  ;;  %v526_v12 = vsel %vm522_vm2, %v517_v7, %v511_v0 }
 0x219   : > { %v547_v15 = vadd.f32 %v542_v3, %v526_v12  ;;  %v548_v16 = vadd.f32 %v546_v4, %v523_v11 }
 0x21b   : > { %v553_v21 = vmax.f32 %v504_v13, %v547_v15  ;;  %v554_v22 = vmax.f32 %v505_v14, %v548_v16  ;;  %v521_v23 = vpop.permute.xlu1 %520 }
 0x21c   : > { %v519_v24 = vpop.permute.xlu0 %518  ;;  %v525_v26 = vsel %vm522_vm2, %v515_v8, %v521_v23  ;;  %v528_v27 = vsel %vm522_vm2, %v521_v23, %v515_v8 }
 0x21d   : > { %v524_v28 = vsel %vm522_vm2, %v513_v63, %v519_v24  ;;  %v527_v29 = vsel %vm522_vm2, %v519_v24, %v513_v63  ;;  %v559_v31 = vmax.f32 %v1284_v44, %v553_v21  ;;  %v560_v32 = vmax.f32 %v1288_v45, %v554_v22 }
 0x21e   : > { %v551_v33 = vadd.f32 %v542_v3, %v528_v27  ;;  %v552_v34 = vadd.f32 %v546_v4, %v525_v26  ;;  %v549_v38 = vadd.f32 %v542_v3, %v527_v29  ;;  %v550_v39 = vadd.f32 %v546_v4, %v524_v28  ;;  %v612_v3 = vld [vmem:[%s1279_s26 + $0x8] sm:$0x5] }
 0x21f   : > { %vm565_vm3 = vcmp.eq.f32.partialorder %v559_v31, %v451_v25  ;;  %vm566_vm5 = vcmp.eq.f32.partialorder %v560_v32, %v452_v30 }
 0x220   : > { %v557_v41 = vmax.f32 %v508_v19, %v551_v33  ;;  %v558_v42 = vmax.f32 %v509_v20, %v552_v34  ;;  %v555_v49 = vmax.f32 %v506_v35, %v549_v38  ;;  %v556_v44 = vmax.f32 %v507_v36, %v550_v39  ;;  %vm1337_vm8 = vmand %vm565_vm3, %vm571_vm4 }
 0x221   : > { %vm1344_vm10 = vmand %vm566_vm5, %vm572_vm6 }
 0x222   : > { %v563_v45 = vmax.f32 %v1282_v43, %v557_v41  ;;  %v564_v50 = vmax.f32 %v1294_v47, %v558_v42  ;;  %v561_v53 = vmax.f32 %v1290_v46, %v555_v49  ;;  %v562_v54 = vmax.f32 %v1296_v48, %v556_v44  ;;  %v454_v43 = vld [vmem:[%s1257_s9 + $0x18] sm:$0xff] }
 0x223   : > { %v1470_v55 = vsel %vm1344_vm10, 4294967295, %v1469_v55  ;;  %vm574_vm3 = vcmp.gt.f32.partialorder %v454_v43, -2.944439  ;;  %v1068_v46 = vmov 0  }
 0x224   : > { %vm569_vm11 = vcmp.eq.f32.partialorder %v563_v45, %v455_v37  ;;  %vm570_vm12 = vcmp.eq.f32.partialorder %v564_v50, %v456_v40  ;;  %vm567_vm15 = vcmp.eq.f32.partialorder %v561_v53, %v453_v52  ;;  %vm568_vm2 = vcmp.eq.f32.partialorder %v562_v54, %v454_v43 }
 0x225   : > { %vm581_vm13 = vmand %vm569_vm11, %vm575_vm7  ;;  %vm605_vm7 = vcmask 1040384   ;;  %vm606_vm11 = vsmask.f32 0 }
 0x226   : > { %vm1349_vm14 = vmand %vm570_vm12, %vm576_vm9  ;;  %vm608_vm12 = vcmask 1042434  }
 0x227   : > { %vm584_vm1 = vmpackc.low %vm581_vm13, %vm581_vm13  ;;  %vm609_vm13 = vsmask.f32 2048 }
 0x228   : > { %vm587_vm4 = vmpackc.low %vm1349_vm14, %vm1349_vm14  ;;  %vm1473_vm14 = vnez %v1470_v55 }
 0x229   : > { %vm579_vm5 = vmand %vm567_vm15, %vm573_vm0 }
 0x22a   : > { %vm580_vm6 = vmand %vm568_vm2, %vm574_vm3 }
 0x22b   : > { %vm583_vm10 = vmpackc.low %vm579_vm5, %vm1337_vm8 }
 0x22c   : > { %vm585_vm9 = vmpackc.even %vm584_vm1, %vm583_vm10 }
 0x22d   : > { %vm586_vm0 = vmpackc.low %vm580_vm6, %vm1473_vm14  ;;  %v589_v48 = vsel %vm585_vm9, 16843009, %v1068_v46 }
 0x22e   : > { %vm588_vm15 = vmpackc.even %vm587_vm4, %vm586_vm0  ;;  %v591_v56 = vunpack.c.0.s8 %v589_v48  ;;  %v593_v57 = vunpack.c.1.s8 %v589_v48  ;;  %v595_v58 = vunpack.c.2.s8 %v589_v48 }
 0x22f   : > { %vm1360_vm2 = vmand %vm605_vm7, %vm606_vm11  ;;  %v590_v60 = vsel %vm588_vm15, 16843009, %v1068_v46 }
 0x230   : > { %vm610_vm8 = vmand %vm608_vm12, %vm609_vm13  ;;  %v592_v61 = vunpack.c.0.s8 %v590_v60  ;;  %v594_v62 = vunpack.c.1.s8 %v590_v60  ;;  %v596_v63 = vunpack.c.2.s8 %v590_v60 }
 0x231   : > { %vm611_vm10 = vmor %vm610_vm8, %vm1360_vm2 }
 0x232   : > { %v597_v0 = vpack.c.b16 %v592_v61, %v591_v56  ;;  %v599_v1 = vpack.c.b16 %v594_v62, %v593_v57  ;;  %v601_v2 = vpack.c.b16 %v596_v63, %v595_v58 }
 0x234   : > { %v598_v4 = vpack.c.b8 %v597_v0, %v597_v0  ;;  %v600_v5 = vpack.c.b8 %v599_v1, %v599_v1  ;;  %v602_v6 = vpack.c.b8 %v601_v2, %v601_v2 }
 0x236   : > { %603 = vst [vmem:[%s1279_s26] sm:$0xf] %v598_v4  ;;  %604 = vst [vmem:[%s1279_s26 + $0x4] sm:$0xf] %v600_v5  ;;  %v613_v7 = vsel %vm611_vm10, %v602_v6, %v612_v3 }
 0x237   : > { %614 = vst [vmem:[%s1279_s26 + $0x8] sm:$0x5] %v613_v7 }
 0x238 PF: > { %s789_s9 = smul.u32 192, %s1045_s28  ;;  %s637_s13 = sshll.u32 %s1279_s26, 4  ;;  %s1377_s13 = int_to_ptr.vmem [resolvable:$true] %s637_s13 }
 0x239   : > { %s1477_s14 = sld [smem:[#allocation15_spill]]  ;;  %s1381_s8 = scalar_lea.sflag [#allocation5], %s290_s11 }
 0x23a   : > { %s937_s18 = scalar_lea.vmem %s1377_s13, 192  ;;  %s1069_s28 = smov [#allocation6]  }
 0x23b   : > { %p938_p6 = scmp.ne.s32.totalorder %s1377_s13, %s937_s18  ;;  %s941_s26 = sshll.u32 %s1069_s28, 4  ;;  %s942_s26 = int_to_ptr.vmem [resolvable:$false] %s941_s26 }
 0x23c   : > { %s943_s15 = scalar_lea.vmem %s942_s26, 384  ;;  %p944_p10 = scmp.lt.s32.totalorder %s1377_s13, %s942_s26 }
 0x23d   : > { %p939_p8 = pnand %p938_p6, %p1189_p12  ;;  %p945_p11 = scmp.lt.s32.totalorder %s943_s15, %s937_s18 }
 0x23f   : > { %s1375_s19 = scalar_lea.hbm %s1477_s14, %s789_s9  ;;  %p940_p9 = pneg %p939_p8 }
 0x240   : > { %p946_p13 = por %p945_p11, %p944_p10 }
 0x242   : > { %p947_p0 = pnand %p946_p13, %p940_p9 }
 0x244   : > { %950 = shalt.err (!%p947_p0)
}
 0x245   : > { %s951_s11 = scalar_lea.hbm %s1375_s19, 192  ;;  %s955_s24 = scalar_lea.hbm %s1477_s14, 384 }
 0x246   : > { %p952_p3 = scmp.ne.s32.totalorder %s1375_s19, %s951_s11  ;;  %p956_p7 = scmp.lt.s32.totalorder %s1375_s19, %s1477_s14 }
 0x247   : > { %p957_p4 = scmp.lt.s32.totalorder %s955_s24, %s951_s11 }
 0x248   : > { %p953_p1 = pnand %p952_p3, %p1189_p12 }
 0x249   : > { %p958_p6 = por %p957_p4, %p956_p7 }
 0x24a   : > { %p954_p5 = pneg %p953_p1 }
 0x24c   : > { %p959_p8 = pnand %p958_p6, %p954_p5 }
 0x24e   : > { %962 = shalt.err (!%p959_p8)
}
 0x24f   : > { %s1070_s17 = smov 64   ;;  %s1071_s4 = smov 4  }
 0x250   : > { %792 = dma.vmem_to_hbm [thread:$0]  (%p1189_p12), %s1377_s13, 192, %s1375_s19, %s1381_s8, %s1070_s17, %s1070_s17, %s1071_s4  }
 0x251 PF: > { %p803_p9 = scmp.ge.s32.totalorder %s1057_s7, 2  ;;  %s660_s18 = sand.u32 1, %s1017_s21  }
 0x252   : > { %s661_s28 = scalar_lea.sflag [#allocation5], %s660_s18 }
 0x253   : > { %p799_p10 = pnand %p803_p9, %p1202_p2 }
 0x255   : > { %p800_p11 = pneg %p799_p10 }
 0x257   : > { %1012 = dma.done.wait (%p800_p11), %s661_s28, 192  }
 0x258   : > { %1014 = vsyncadd (%p800_p11), %s661_s28, 4294967104  ;;  %s23_s7 = sadd.s32 1, %s1057_s7   ;;  %s1478_s16 = sld [smem:[#allocation9_spill]] }
 0x259   : > { %p20_p13 = scmp.ge.s32.totalorder %s23_s7, 6   ;;  %s1479_s26 = sld [smem:[#allocation13_spill]] }
 0x25a   : > { %s1480_s13 = sld [smem:[#allocation10_spill]]  ;;  %s1482_s21 = smov %s1021_s22 }
 0x25b   : > { %s1481_s19 = sld [smem:[#allocation11_spill]]  ;;  %s1483_s22 = smov %s1025_s23 }
 0x25c   : > { %s1484_s23 = smov %s1194_s20  ;;  %s1485_s24 = smov %s1033_s25 }
 0x25d   : > { %s1487_s27 = smov %s1049_s29  ;;  %s1488_s28 = smov %s1053_s30 }
 0x25e   : > { %s1486_s25 = smov %s1478_s16  ;;  %22 = sbr.rel (!%p20_p13) target bundleno = 12 (0xc), region = 103 }
 0x260   : > { %s1489_s29 = smov %s1480_s13 }
 0x261   : > { %s1490_s30 = smov %s1481_s19 }
 0x263   :  { %666 = vsyncpa [#allocation4], 1 }
 0x264   :  { %668 = vsyncpa [#allocation4 + $0x1], 1 }
 0x265   :  { %669 = vsyncpa [#allocation5], 1 }
 0x266   :  { %671 = vsyncpa [#allocation5 + $0x1], 1 }

</bundles_post_ra>
